<compile_context>
chip_gen: v6e
topology: v6e:2x2x1
jax: 0.10.0
libtpu: 0.0.40
codegen_flags: <defaults>
</compile_context>

<pallas_src>
import functools
import math

import jax
import jax.numpy as jnp
from jax.experimental import pallas as pl
from jax.experimental.pallas import tpu as pltpu

LANE = 128   # lane width / feature padding quantum
TILE = 128   # dst/src node-row tile


def _round_up(x, m):
    return (x + m - 1) // m * m


def _pad2d(x, rows, cols):
    r, c = x.shape
    return jnp.pad(x, ((0, rows - r), (0, cols - c)))


# --------------------------------------------------------------------------
# Kernel 1: XW = X @ W  (tile-invariant part of the layer, hoisted out of the
# per-dst-tile loop).  Tiled over source-node rows.
# --------------------------------------------------------------------------
def _xw_kernel(x_ref, w_ref, o_ref):
    o_ref[...] = jnp.dot(
        x_ref[...], w_ref[...], preferred_element_type=jnp.float32
    ).astype(o_ref.dtype)


def xw_matmul(x_bf16, w_bf16, *, row_tile=TILE):
    n_rows, f_in = x_bf16.shape
    f_in2, f_out = w_bf16.shape
    assert f_in == f_in2 and n_rows % row_tile == 0
    return pl.pallas_call(
        _xw_kernel,
        out_shape=jax.ShapeDtypeStruct((n_rows, f_out), jnp.bfloat16),
        grid_spec=pltpu.PrefetchScalarGridSpec(
            num_scalar_prefetch=0,
            grid=(n_rows // row_tile,),
            in_specs=[
                pl.BlockSpec((row_tile, f_in), lambda i: (i, 0)),
                pl.BlockSpec((f_in, f_out), lambda i: (0, 0)),
            ],
            out_specs=pl.BlockSpec((row_tile, f_out), lambda i: (i, 0)),
        ),
        compiler_params=pltpu.CompilerParams(
            dimension_semantics=("parallel",),
            vmem_limit_bytes=48 * 1024 * 1024,
        ),
    )(x_bf16, w_bf16)


# --------------------------------------------------------------------------
# Kernel 2: per-dst-tile  y = (A_tile @ XW) * norm + b ; activation / concat.
# --------------------------------------------------------------------------
def _gcn_tile_kernel(a_ref, xw_ref, norm_ref, b_ref, o_ref, *, mode, f_out_pad):
    # message passing + linear, reassociated: single MXU matmul per tile.
    agg = jnp.dot(a_ref[...], xw_ref[...], preferred_element_type=jnp.float32)
    # norm commutes with W -> apply on the narrow (tile, f_out_pad) tensor (VPU).
    y = agg * norm_ref[...] + b_ref[...]
    if mode == "relu":
        o_ref[...] = jnp.maximum(y, 0.0)
    elif mode == "concat":
        # concat=True: torch.cat((h, activation(h)), dim=1) -> two direct stores.
        o_ref[:, :f_out_pad] = y
        o_ref[:, f_out_pad:] = jnp.maximum(y, 0.0)
    else:
        o_ref[...] = y


def gcn_tile_layer(a_bf16, xw_bf16, norm, bias, *, mode, f_out_pad, dst_tile=TILE):
    n_dst_p, n_src_p = a_bf16.shape
    assert xw_bf16.shape == (n_src_p, f_out_pad)
    assert n_dst_p % dst_tile == 0
    out_w = 2 * f_out_pad if mode == "concat" else f_out_pad

    kernel = functools.partial(_gcn_tile_kernel, mode=mode, f_out_pad=f_out_pad)
    return pl.pallas_call(
        kernel,
        out_shape=jax.ShapeDtypeStruct((n_dst_p, out_w), jnp.float32),
        grid_spec=pltpu.PrefetchScalarGridSpec(
            num_scalar_prefetch=0,
            grid=(n_dst_p // dst_tile,),
            in_specs=[
                pl.BlockSpec((dst_tile, n_src_p), lambda i: (i, 0)),   # A tile
                pl.BlockSpec((n_src_p, f_out_pad), lambda i: (0, 0)),  # XW (resident)
                pl.BlockSpec((dst_tile, 1), lambda i: (i, 0)),         # norm tile
                pl.BlockSpec((1, f_out_pad), lambda i: (0, 0)),        # bias
            ],
            out_specs=pl.BlockSpec((dst_tile, out_w), lambda i: (i, 0)),
        ),
        compiler_params=pltpu.CompilerParams(
            dimension_semantics=("parallel",),
            vmem_limit_bytes=48 * 1024 * 1024,
        ),
    )(a_bf16, xw_bf16, norm, bias)


# --------------------------------------------------------------------------
# Model wrapper mirroring GCNInfer(in_feats, n_hidden, n_classes, n_layers, relu).
# --------------------------------------------------------------------------
class GCNInferPallas:

    def __init__(self, in_feats, n_hidden, n_classes, n_layers, key):
        self.n_layers = n_layers
        self.n_classes = n_classes

        # layer definitions (true feature sizes + mode), same schedule as GCNInfer
        layer_defs = []
        skip_start = (0 == n_layers - 1)
        layer_defs.append((in_feats, n_hidden, "concat" if skip_start else "relu"))
        for i in range(1, n_layers):
            skip_start = (i == n_layers - 1)
            layer_defs.append((n_hidden, n_hidden, "concat" if skip_start else "relu"))
        layer_defs.append((2 * n_hidden, n_classes, "none"))   # final: no activation

        # true (unpadded) params — nn.Linear default init range
        self.true_params = []
        for (fi, fo, mode) in layer_defs:
            key, k_w, k_b = jax.random.split(key, 3)
            bound = 1.0 / math.sqrt(fi)
            w = jax.random.uniform(k_w, (fo, fi), jnp.float32, -bound, bound)
            b = jax.random.uniform(k_b, (fo,), jnp.float32, -bound, bound)
            self.true_params.append((jnp.transpose(w), b.reshape(1, fo), mode))

        # padded (lane-dense) params; track the padded input layout across layers
        # segments: (lane_offset_in_padded_input, true_row_offset_in_W, length)
        self.pad_params = []
        segs = [(0, 0, in_feats)]
        in_pad = _round_up(in_feats, LANE)
        self.in_pad0 = in_pad
        for (w_t, b, mode), (fi, fo, _) in zip(self.true_params, layer_defs):
            fo_pad = _round_up(fo, LANE)
            w_pad = jnp.zeros((in_pad, fo_pad), jnp.float32)
            for (lane_off, true_off, length) in segs:
                w_pad = w_pad.at[lane_off:lane_off + length, :fo].set(
                    w_t[true_off:true_off + length, :])
            b_pad = jnp.zeros((1, fo_pad), jnp.float32).at[:, :fo].set(b)
            self.pad_params.append((w_pad, b_pad, mode, fo, fo_pad))
            if mode == "concat":
                segs = [(0, 0, fo), (fo_pad, fo, fo)]
                in_pad = 2 * fo_pad
            else:
                segs = [(0, 0, fo)]
                in_pad = fo_pad

    # ---- Pallas forward -------------------------------------------------
    def __call__(self, features, blocks, norms):
        bf = jnp.bfloat16
        n0 = features.shape[0]
        x = _pad2d(features, _round_up(n0, TILE), self.in_pad0)   # padded layout, f32
        last_n_dst = n0
        for (w_pad, b_pad, mode, fo, fo_pad), a, norm in zip(
                self.pad_params, blocks, norms):
            n_dst, n_src = a.shape
            n_dst_p = _round_up(n_dst, TILE)
            n_src_p = _round_up(n_src, TILE)
            a_p = _pad2d(a, n_dst_p, n_src_p).astype(bf)      # 0/1 exact in bf16
            norm_p = _pad2d(norm, n_dst_p, 1)
            # hoisted, tile-invariant weight matmul
            xw = xw_matmul(x.astype(bf), w_pad.astype(bf))
            # per-dst-tile fused aggregate + norm + bias + activation/concat
            x = gcn_tile_layer(a_p, xw, norm_p, b_pad, mode=mode, f_out_pad=fo_pad)
            last_n_dst = n_dst
        return x[:last_n_dst, :self.n_classes]

    # ---- pure-JAX references --------------------------------------------
    def reference_f32(self, features, blocks, norms):
        """Original (PyTorch-order) math in f32, unpadded."""
        h = features
        for (w_t, b, mode), a, norm in zip(self.true_params, blocks, norms):
            y = ((a @ h) * norm) @ w_t + b
            if mode == "relu":
                y = jnp.maximum(y, 0.0)
            elif mode == "concat":
                y = jnp.concatenate([y, jnp.maximum(y, 0.0)], axis=-1)
            h = y
        return h

    def reference_matched(self, features, blocks, norms):
        """Mirrors the kernel math + bf16 input rounding for a tight comparison."""
        bf, f32 = jnp.bfloat16, jnp.float32
        n0 = features.shape[0]
        x = _pad2d(features, _round_up(n0, TILE), self.in_pad0)
        last_n_dst = n0
        for (w_pad, b_pad, mode, fo, fo_pad), a, norm in zip(
                self.pad_params, blocks, norms):
            n_dst, n_src = a.shape
            a_p = _pad2d(a, _round_up(n_dst, TILE),
                         _round_up(n_src, TILE)).astype(bf).astype(f32)
            norm_p = _pad2d(norm, _round_up(n_dst, TILE), 1)
            xw = (x.astype(bf).astype(f32) @ w_pad.astype(bf).astype(f32)
                  ).astype(bf).astype(f32)
            y = (a_p @ xw) * norm_p + b_pad
            if mode == "relu":
                x = jnp.maximum(y, 0.0)
            elif mode == "concat":
                x = jnp.concatenate([y, jnp.maximum(y, 0.0)], axis=-1)
            else:
                x = y
            last_n_dst = n_dst
        return x[:last_n_dst, :self.n_classes]


if __name__ == "__main__":
    in_feats, n_hidden, n_classes, n_layers = 16, 32, 8, 2
    # NodeFlow node-layer sizes: n_layers + 2 layers of nodes (widest first).
    layer_nodes = [64, 32, 16, 8]

    key = jax.random.PRNGKey(0)
    key, k_feat, k_param = jax.random.split(key, 3)
    features = jax.random.normal(k_feat, (layer_nodes[0], in_feats), jnp.float32)

    # Dense block adjacencies (dst x src) standing in for sampled NodeFlow blocks,
    # plus per-dst-node norm = 1 / (in_degree + 1).
    # (The DGL sparse block_compute / sampling machinery itself has no Pallas
    #  equivalent; it is modeled as dense 0/1 A @ X here.)
    blocks, norms = [], []
    for li in range(len(layer_nodes) - 1):
        key, k_a = jax.random.split(key)
        a = (jax.random.uniform(k_a, (layer_nodes[li + 1], layer_nodes[li])) < 0.3
             ).astype(jnp.float32)
        blocks.append(a)
        norms.append(1.0 / (jnp.sum(a, axis=1, keepdims=True) + 1.0))

    model = GCNInferPallas(in_feats, n_hidden, n_classes, n_layers, k_param)

    out = model(features, blocks, norms)
    out = jax.block_until_ready(out)
    assert out.shape == (layer_nodes[-1], n_classes)

    # Tight check vs a reference that mirrors the kernel's bf16 input rounding.
    ref_m = model.reference_matched(features, blocks, norms)
    assert jnp.allclose(out, ref_m, rtol=1e-2, atol=1e-2), "matched ref mismatch"

    # Loose check vs the original-order full-f32 semantics (bf16 MXU inputs).
    ref32 = model.reference_f32(features, blocks, norms)
    assert jnp.allclose(out, ref32, rtol=5e-2, atol=2e-2), "f32 ref mismatch"

    print("KERNEL_OK")
</pallas_src>

<mosaic_0001>
module attributes {stable_mosaic.version = 11 : i64} {
  func.func @_xw_kernel(%arg0: i32, %arg1: memref<128x128xbf16, #tpu.memory_space<vmem>>, %arg2: memref<128x128xbf16, #tpu.memory_space<vmem>>, %arg3: memref<128x128xbf16, #tpu.memory_space<vmem>>) attributes {dimension_semantics = [#tpu.dimension_semantics<parallel>], iteration_bounds = array<i64: 1>, scalar_prefetch = 0 : i64, scratch_operands = 0 : i64, tpu.core_type = #tpu.core_type<tc>, window_params = [{transform_indices = @transform_0, window_bounds = array<i64: 128, 128>}, {pipeline_mode = #tpu.pipeline_mode<synchronous>, transform_indices = @transform_1, window_bounds = array<i64: 128, 128>}, {transform_indices = @transform_2, window_bounds = array<i64: 128, 128>}]} {
    %c0 = arith.constant 0 : index
    %c0_0 = arith.constant 0 : index
    %0 = vector.load %arg1[%c0, %c0_0] : memref<128x128xbf16, #tpu.memory_space<vmem>>, vector<128x128xbf16>
    %c0_1 = arith.constant 0 : index
    %c0_2 = arith.constant 0 : index
    %1 = vector.load %arg2[%c0_1, %c0_2] : memref<128x128xbf16, #tpu.memory_space<vmem>>, vector<128x128xbf16>
    %cst = arith.constant dense<0.000000e+00> : vector<128x128xf32>
    %2 = tpu.matmul %0, %1, %cst {dimension_numbers = #tpu.dot_dimension_numbers<[1], [0], [0], [1], [0, 0, 1, 1], [], []>} : vector<128x128xbf16>, vector<128x128xbf16>, vector<128x128xf32> -> vector<128x128xf32>
    %3 = arith.truncf %2 : vector<128x128xf32> to vector<128x128xbf16>
    %c0_3 = arith.constant 0 : index
    %c0_4 = arith.constant 0 : index
    %4 = vector.load %arg3[%c0_3, %c0_4] : memref<128x128xbf16, #tpu.memory_space<vmem>>, vector<128x128xbf16>
    tpu.vector_store %arg3[%c0_3, %c0_4], %3 {strides = array<i32>} : memref<128x128xbf16, #tpu.memory_space<vmem>>, vector<128x128xbf16>,
    return
  }
  func.func @transform_0(%arg0: i32) -> (i32, i32) {
    %c0_i32 = arith.constant 0 : i32
    %c0_i32_0 = arith.constant 0 : i32
    return %arg0, %c0_i32 : i32, i32
  }
  func.func @transform_1(%arg0: i32) -> (i32, i32) {
    %c0_i32 = arith.constant 0 : i32
    %c0_i32_0 = arith.constant 0 : i32
    %c0_i32_1 = arith.constant 0 : i32
    return %c0_i32, %c0_i32_0 : i32, i32
  }
  func.func @transform_2(%arg0: i32) -> (i32, i32) {
    %c0_i32 = arith.constant 0 : i32
    %c0_i32_0 = arith.constant 0 : i32
    return %arg0, %c0_i32 : i32, i32
  }
}

</mosaic_0001>

<bundles_post_ra>
// kernel: tpu_custom_call.1
= control target key start
LH: loop header
LB: loop body
LE: loop exit
PB: predicated region body
PF: predicated region fallthrough
CT: control target
= control target key end

     0   :  { %7 = vsyncpa [#allocation3], 0  ;;  %s648_s0 = inlined_call_operand.hbm [shape: bf16[128,128], index: 0, kind: input, shape index: {}]   ;;  %s649_s1 = inlined_call_operand.hbm [shape: bf16[128,128], index: 1, kind: input, shape index: {}]   ;;  %s650_s2 = inlined_call_operand.hbm [shape: bf16[128,128], index: 2, kind: output, shape index: {}]  }
   0x1   :  { %8 = vsyncpa [#allocation6], 0 }
   0x2   :  { %9 = vsyncpa [#allocation4], 0  ;;  %s610_s9 = smov [#allocation2]  }
   0x3   :  { %s15_s10 = sshll.u32 %s610_s9, 4  ;;  %s16_s10 = int_to_ptr.vmem [resolvable:$true] %s15_s10 }
   0x4   :  { %s552_s11 = scalar_lea.vmem %s16_s10, 1024  ;;  %p557_p1 = scmp.lt.s32.totalorder %s16_s10, %s16_s10 }
   0x5   :  { %p553_p0 = scmp.ne.s32.totalorder %s16_s10, %s552_s11  ;;  %p558_p2 = scmp.lt.s32.totalorder %s552_s11, %s552_s11 }
   0x7   :  { %p559_p3 = por %p558_p2, %p557_p1 }
   0x9   :  { %p560_p4 = pnand %p559_p3, %p553_p0 }
   0xb   :  { %563 = shalt.err (!%p560_p4)
}
   0xc   :  { %s611_s12 = smov 64   ;;  %s612_s13 = smov 4  }
   0xd   :  { %21 = dma.hbm_to_vmem [thread:$0]  %s648_s0, 1024, %s16_s10, [#allocation3], %s611_s12, %s611_s12, %s612_s13  }
   0xe   :  { %s613_s16 = smov [#allocation5]  }
   0xf   :  { %s27_s17 = sshll.u32 %s613_s16, 4  ;;  %s28_s17 = int_to_ptr.vmem [resolvable:$true] %s27_s17 }
  0x10   :  { %s572_s18 = scalar_lea.vmem %s28_s17, 1024  ;;  %p577_p6 = scmp.lt.s32.totalorder %s28_s17, %s28_s17 }
  0x11   :  { %p573_p5 = scmp.ne.s32.totalorder %s28_s17, %s572_s18  ;;  %p578_p7 = scmp.lt.s32.totalorder %s572_s18, %s572_s18 }
  0x13   :  { %p579_p8 = por %p578_p7, %p577_p6 }
  0x15   :  { %p580_p9 = pnand %p579_p8, %p573_p5 }
  0x17   :  { %583 = shalt.err (!%p580_p9)
}
  0x18   :  { %33 = dma.hbm_to_vmem [thread:$0]  %s649_s1, 1024, %s28_s17, [#allocation6], %s611_s12, %s611_s12, %s612_s13  }
  0x19   :  { %604 = dma.done.wait [#allocation3], 1024  }
  0x1a   :  { %605 = vsyncadd [#allocation3], 4294966272 }
  0x1b   :  { %606 = dma.done.wait [#allocation6], 1024  }
  0x1c   :  { %607 = vsyncadd [#allocation6], 4294966272  ;;  %v528_v0 = vld [vmem:[#allocation5 + $0x38] sm:$0xff]   ;;  %v529_v1 = vld [vmem:[#allocation5 + $0x30] sm:$0xff]   ;;  %s614_s0 = smov [#allocation7]  }
  0x1d   :  { %475 = vmatprep.subr.bf16.mxu0 %v528_v0  ;;  %507 = vmatprep.subr.bf16.mxu1 %v528_v0  ;;  %v530_v2 = vld [vmem:[#allocation5 + $0x28] sm:$0xff]   ;;  %v531_v3 = vld [vmem:[#allocation5 + $0x20] sm:$0xff]   ;;  %v532_v6 = vld [vmem:[#allocation5 + $0x18] sm:$0xff]   ;;  %s351_s1 = sshll.u32 %s614_s0, 4  ;;  %s352_s1 = int_to_ptr.vmem [resolvable:$true] %s351_s1 }
  0x1e   :  { %476 = vmatpush3.bf16.msra.mxu0 %v528_v0  ;;  %515 = vmatpush3.bf16.msra.mxu1 %v528_v0  ;;  %v536_v4 = vld [vmem:[#allocation2] sm:$0xff]   ;;  %v533_v7 = vld [vmem:[#allocation5 + $0x10] sm:$0xff]   ;;  %v534_v8 = vld [vmem:[#allocation5 + $0x8] sm:$0xff]   ;;  %s584_s21 = scalar_lea.vmem %s352_s1, 1024  ;;  %p589_p11 = scmp.lt.s32.totalorder %s352_s1, %s352_s1 }
  0x1f   :  { %477 = vmatprep.subr.bf16.mxu0 %v529_v1  ;;  %508 = vmatprep.subr.bf16.mxu1 %v529_v1  ;;  %v537_v5 = vld [vmem:[#allocation2 + $0x20] sm:$0xff]   ;;  %v538_v10 = vld [vmem:[#allocation2 + $0x8] sm:$0xff]   ;;  %v540_v12 = vld [vmem:[#allocation2 + $0x10] sm:$0xff]   ;;  %p585_p10 = scmp.ne.s32.totalorder %s352_s1, %s584_s21  ;;  %p590_p12 = scmp.lt.s32.totalorder %s584_s21, %s584_s21 }
  0x20   :  { %491 = vmatprep.mubr.bf16.mxu0 %v536_v4  ;;  %499 = vmatprep.mubr.bf16.mxu1 %v537_v5  ;;  %v535_v9 = vld [vmem:[#allocation5] sm:$0xff]   ;;  %v539_v11 = vld [vmem:[#allocation2 + $0x28] sm:$0xff]   ;;  %v541_v13 = vld [vmem:[#allocation2 + $0x30] sm:$0xff]  }
  0x21   :  { %v542_v14 = vld [vmem:[#allocation2 + $0x18] sm:$0xff]   ;;  %p591_p13 = por %p590_p12, %p589_p11 }
  0x22   :  { %478 = vmatpush3.bf16.msra.mxu0 %v529_v1  ;;  %516 = vmatpush3.bf16.msra.mxu1 %v529_v1  ;;  %v543_v15 = vld [vmem:[#allocation2 + $0x38] sm:$0xff]  }
  0x23   :  { %479 = vmatprep.subr.bf16.mxu0 %v530_v2  ;;  %509 = vmatprep.subr.bf16.mxu1 %v530_v2  ;;  %p592_p0 = pnand %p591_p13, %p585_p10 }
  0x26   :  { %480 = vmatpush3.bf16.msra.mxu0 %v530_v2  ;;  %517 = vmatpush3.bf16.msra.mxu1 %v530_v2 }
  0x27   :  { %481 = vmatprep.subr.bf16.mxu0 %v531_v3  ;;  %510 = vmatprep.subr.bf16.mxu1 %v531_v3 }
  0x2a   :  { %482 = vmatpush3.bf16.msra.mxu0 %v531_v3  ;;  %518 = vmatpush3.bf16.msra.mxu1 %v531_v3 }
  0x2b   :  { %483 = vmatprep.subr.bf16.mxu0 %v532_v6  ;;  %511 = vmatprep.subr.bf16.mxu1 %v532_v6 }
  0x2e   :  { %484 = vmatpush3.bf16.msra.mxu0 %v532_v6  ;;  %519 = vmatpush3.bf16.msra.mxu1 %v532_v6 }
  0x2f   :  { %485 = vmatprep.subr.bf16.mxu0 %v533_v7  ;;  %512 = vmatprep.subr.bf16.mxu1 %v533_v7 }
  0x32   :  { %486 = vmatpush3.bf16.msra.mxu0 %v533_v7  ;;  %520 = vmatpush3.bf16.msra.mxu1 %v533_v7 }
  0x33   :  { %487 = vmatprep.subr.bf16.mxu0 %v534_v8  ;;  %513 = vmatprep.subr.bf16.mxu1 %v534_v8 }
  0x36   :  { %488 = vmatpush3.bf16.msra.mxu0 %v534_v8  ;;  %521 = vmatpush3.bf16.msra.mxu1 %v534_v8 }
  0x37   :  { %489 = vmatprep.subr.bf16.mxu0 %v535_v9  ;;  %514 = vmatprep.subr.bf16.mxu1 %v535_v9 }
  0x3a   :  { %490 = vmatpush3.bf16.msra.mxu0 %v535_v9  ;;  %522 = vmatpush3.bf16.msra.mxu1 %v535_v9 }
  0x3d   :  { %492 = vmatmul.mubr.bf16.vlgmr.msra.gmra.mxu0 %v538_v10  ;;  %500 = vmatmul.mubr.bf16.vlgmr.msra.gmra.mxu1 %v539_v11 }
  0x3e   :  { %495 = vmatprep.mubr.bf16.mxu0 %v540_v12  ;;  %503 = vmatprep.mubr.bf16.mxu1 %v541_v13 }
  0x45   :  { %496 = vmatmul.mubr.bf16.gmra.mxu0 %v542_v14  ;;  %504 = vmatmul.mubr.bf16.gmra.mxu1 %v543_v15 }
  0xfd   :  { %v493_v16 = vpop.f32.mrf.mxu0  ;;  %v501_v17 = vpop.f32.mrf.mxu1 }
  0xff   :  { %v203_v18 = vpop.f32.mrf.mxu0  ;;  %v235_v19 = vpop.f32.mrf.mxu1 }
 0x101   :  { %v494_v20 = vpop.f32.mrf.mxu0  ;;  %v502_v21 = vpop.f32.mrf.mxu1 }
 0x102   :  { %v420_v22 = vpack.c.bf16 %v494_v20, %v493_v16  ;;  %v440_v23 = vpack.c.bf16 %v502_v21, %v501_v17 }
 0x103   :  { %v206_v24 = vpop.f32.mrf.mxu0  ;;  %v238_v25 = vpop.f32.mrf.mxu1 }
 0x104   :  { %452 = vst [vmem:[#allocation7 + $0x8] sm:$0xff] %v420_v22   ;;  %456 = vst [vmem:[#allocation7 + $0x28] sm:$0xff] %v440_v23   ;;  %v415_v26 = vpack.c.bf16 %v206_v24, %v203_v18  ;;  %v435_v27 = vpack.c.bf16 %v238_v25, %v235_v19 }
 0x105   :  { %v497_v28 = vpop.f32.mrf.mxu0  ;;  %v505_v29 = vpop.f32.mrf.mxu1 }
 0x106   :  { %416 = vst [vmem:[#allocation7] sm:$0xff] %v415_v26   ;;  %455 = vst [vmem:[#allocation7 + $0x20] sm:$0xff] %v435_v27  }
 0x107   :  { %v219_v30 = vpop.f32.mrf.mxu0  ;;  %v251_v31 = vpop.f32.mrf.mxu1 }
 0x109   :  { %v498_v32 = vpop.f32.mrf.mxu0  ;;  %v506_v33 = vpop.f32.mrf.mxu1 }
 0x10a   :  { %v430_v34 = vpack.c.bf16 %v498_v32, %v497_v28  ;;  %v450_v35 = vpack.c.bf16 %v506_v33, %v505_v29 }
 0x10b   :  { %v222_v36 = vpop.f32.mrf.mxu0  ;;  %v254_v37 = vpop.f32.mrf.mxu1 }
 0x10c   :  { %454 = vst [vmem:[#allocation7 + $0x18] sm:$0xff] %v430_v34   ;;  %458 = vst [vmem:[#allocation7 + $0x38] sm:$0xff] %v450_v35   ;;  %v425_v38 = vpack.c.bf16 %v222_v36, %v219_v30  ;;  %v445_v39 = vpack.c.bf16 %v254_v37, %v251_v31 }
 0x10e   :  { %453 = vst [vmem:[#allocation7 + $0x10] sm:$0xff] %v425_v38   ;;  %457 = vst [vmem:[#allocation7 + $0x30] sm:$0xff] %v445_v39  }
 0x10f   :  { %595 = shalt.err (!%p592_p0)
}
 0x110   :  { %357 = dma.vmem_to_hbm [thread:$0]  %s352_s1, 1024, %s650_s2, [#allocation4], %s611_s12, %s611_s12, %s612_s13  }
 0x111   :  { %608 = dma.done.wait [#allocation4], 1024  }
 0x112   :  { %609 = vsyncadd [#allocation4], 4294966272 }
 0x113   :  { %361 = vsyncpa [#allocation3], 1 }
 0x114   :  { %362 = vsyncpa [#allocation6], 1 }
 0x115   :  { %363 = vsyncpa [#allocation4], 1 }

</bundles_post_ra>
